<compile_context>
chip_gen: v7x
topology: tpu7x:2x2x1
jax: 0.10.0
libtpu: 0.0.40
codegen_flags: <defaults>
</compile_context>

<pallas_src>
import jax
import jax.numpy as jnp
from jax.experimental import pallas as pl
from jax.experimental.pallas import tpu as pltpu


# --------------------------------------------------------------------------- #
# Kernels
# --------------------------------------------------------------------------- #
def _mlp_kernel_resident(x_ref, w1_ref, b1_ref, w2_ref, b2_ref, o_ref):
    """Whole (padded) hidden dim resident in VMEM: single pass, no accumulator."""
    # Per-tile cast of x on the VPU (hides under MXU slack; avoids a separate
    # wrapper-side cast pass over x in HBM).
    x = x_ref[...].astype(w1_ref.dtype)
    h = jnp.dot(x, w1_ref[...], preferred_element_type=jnp.float32)
    h = jnp.maximum(h + b1_ref[...], 0.0)                 # bias + ReLU in f32
    out = jnp.dot(h.astype(w2_ref.dtype), w2_ref[...],
                  preferred_element_type=jnp.float32)
    o_ref[...] = (out + b2_ref[...]).astype(o_ref.dtype)


def _mlp_kernel_hsplit(x_ref, w1_ref, b1_ref, w2_ref, b2_ref, o_ref, acc_ref):
    """Hidden dim streamed in chunks; fc2 partials accumulated in f32 scratch."""
    k = pl.program_id(1)

    @pl.when(k == 0)
    def _():
        acc_ref[...] = jnp.zeros_like(acc_ref)

    x = x_ref[...].astype(w1_ref.dtype)
    h = jnp.dot(x, w1_ref[...], preferred_element_type=jnp.float32)
    h = jnp.maximum(h + b1_ref[...], 0.0)                 # exact per H-chunk
    acc_ref[...] += jnp.dot(h.astype(w2_ref.dtype), w2_ref[...],
                            preferred_element_type=jnp.float32)

    @pl.when(k == pl.num_programs(1) - 1)
    def _():
        o_ref[...] = (acc_ref[...] + b2_ref[...]).astype(o_ref.dtype)


# --------------------------------------------------------------------------- #
# Tiling / VMEM planning
# --------------------------------------------------------------------------- #
def _round_up(x, m):
    return ((x + m - 1) // m) * m


def _vmem_budget_and_limit():
    """Compiler vmem_limit and a (smaller) planning budget with headroom for
    compiler-internal scratch / semaphores, derived from physical VMEM."""
    try:
        cap = int(pltpu.get_tpu_info().vmem_capacity_bytes)
    except Exception:
        cap = 64 * 1024 * 1024                      # conservative (v7x per-TC)
    if cap <= 64 * 1024 * 1024:                     # v7x-class: leave ~8 MiB
        limit = cap - 8 * 1024 * 1024
    else:                                           # v5e/v6e 128 MiB: use most
        limit = min(cap - 16 * 1024 * 1024, 112 * 1024 * 1024)
    return limit - 4 * 1024 * 1024, limit


def _footprint_bytes(tb, th, d_in_p, d_out_p, w_bytes, x_bytes, out_bytes):
    """VMEM model INCLUDING Pallas' default 2x double-buffering per spec."""
    weights = 2 * (d_in_p * th + th * d_out_p) * w_bytes        # w1, w2
    biases = 2 * 8 * (th + d_out_p) * 4                         # b1, b2 (sublane pad)
    acts = 2 * tb * d_in_p * x_bytes + 2 * tb * d_out_p * out_bytes
    acc = tb * d_out_p * 4                                      # f32 accumulator
    h_tmp = tb * th * (4 + w_bytes)                             # fc1 out + bf16 copy
    return weights + biases + acts + acc + h_tmp


def _pick_tiles(B, d_in_p, h_p, d_out_p, w_bytes, x_bytes, out_bytes,
                budget, lane_align):
    b_cap = _round_up(max(B, 16), 16)
    tb_candidates = [b_cap] + [t for t in (2048, 1024, 512, 256, 128, 64, 32, 16)
                               if t < b_cap]
    th_candidates = []
    th = h_p
    while True:
        th_candidates.append(th)
        if th <= lane_align:
            break
        th = _round_up(th // 2, lane_align)
    # Prefer keeping the full hidden dim (weights loaded once, VMEM-resident);
    # only split H when even the smallest batch tile does not fit.
    for th in th_candidates:
        for tb in tb_candidates:
            if _footprint_bytes(tb, th, d_in_p, d_out_p,
                                w_bytes, x_bytes, out_bytes) <= budget:
                return tb, th
    return 16, lane_align


# --------------------------------------------------------------------------- #
# Wrapper
# --------------------------------------------------------------------------- #
def mlp_forward(x, w1, b1, w2, b2, *, compute_dtype=jnp.bfloat16,
                out_dtype=jnp.float32, block_b=None, block_h=None,
                lane_align=128):
    """Fused fc1 -> ReLU -> fc2.

    x: (..., D_in); w1: (D_in, H); b1: (H,) or (1, H); w2: (H, D_out);
    b2: (D_out,) or (1, D_out).  Returns (..., D_out) in out_dtype.
    Use compute_dtype=jnp.float32 for strict parity with the f32 PyTorch MLP;
    lane_align=256 better fills the 256x256 MXU on v6e/v7x for large dims.
    """
    orig_shape = x.shape
    if x.ndim != 2:
        x = x.reshape(-1, orig_shape[-1])
    B, D_in = x.shape
    D_in_w, H = w1.shape
    H_w, D_out = w2.shape
    if b1.ndim == 1:
        b1 = b1[None, :]
    if b2.ndim == 1:
        b2 = b2[None, :]
    assert D_in == D_in_w and H == H_w
    assert b1.shape == (1, H) and b2.shape == (1, D_out)

    # Lane-dense padding of every matmul dim.
    d_in_p = _round_up(D_in, lane_align)
    d_out_p = _round_up(D_out, lane_align)
    h_p0 = _round_up(H, lane_align)

    w_bytes = jnp.dtype(compute_dtype).itemsize
    x_bytes = jnp.dtype(x.dtype).itemsize
    out_bytes = jnp.dtype(out_dtype).itemsize

    budget, vmem_limit = _vmem_budget_and_limit()
    tb, th = _pick_tiles(B, d_in_p, h_p0, d_out_p, w_bytes, x_bytes, out_bytes,
                         budget, lane_align)
    if block_b is not None:
        tb = _round_up(block_b, 16)
    elif B > 16 and tb >= B:
        # Guarantee >= 2 batch steps so the "parallel" axis can shard across
        # both TensorCores on dual-TC chips (v7x); negligible cost on 1-TC.
        tb = max(16, _round_up(-(-B // 2), 16))
    if block_h is not None:
        th = _round_up(block_h, lane_align)

    b_p = _round_up(B, tb)
    h_p = _round_up(H, th)              # re-pad so th divides the padded H
    nb, nh = b_p // tb, h_p // th

    # Pad only when needed (pads / slices are extra HBM passes); zero padding
    # keeps the math exact.  x keeps its dtype and is cast in-kernel.
    def pad2(a, r, c):
        return a if a.shape == (r, c) else jnp.pad(
            a, ((0, r - a.shape[0]), (0, c - a.shape[1])))

    xc = pad2(x, b_p, d_in_p)
    w1c = pad2(w1, d_in_p, h_p).astype(compute_dtype)
    w2c = pad2(w2, h_p, d_out_p).astype(compute_dtype)
    b1c = pad2(b1.astype(jnp.float32), 1, h_p)
    b2c = pad2(b2.astype(jnp.float32), 1, d_out_p)

    flops = 2 * B * (D_in * H + H * D_out)
    weight_hbm = (w1c.size + w2c.size) * w_bytes
    bytes_accessed = (xc.size * x_bytes + (1 if nh == 1 else nb) * weight_hbm
                      + (b1c.size + b2c.size) * 4 + b_p * d_out_p * out_bytes)
    cost = pl.CostEstimate(flops=flops, transcendentals=0,
                           bytes_accessed=bytes_accessed)
    compiler_params = pltpu.CompilerParams(
        dimension_semantics=("parallel",) if nh == 1 else ("parallel", "arbitrary"),
        vmem_limit_bytes=vmem_limit)
    out_shape = jax.ShapeDtypeStruct((b_p, d_out_p), out_dtype)

    if nh == 1:
        # Weights/biases VMEM-resident (constant index_map, DMA'd once);
        # x / out streamed per batch tile with auto double-buffering.
        out_p = pl.pallas_call(
            _mlp_kernel_resident,
            out_shape=out_shape,
            grid=(nb,),
            in_specs=[
                pl.BlockSpec((tb, d_in_p), lambda i: (i, 0)),
                pl.BlockSpec((d_in_p, h_p), lambda i: (0, 0)),
                pl.BlockSpec((1, h_p), lambda i: (0, 0)),
                pl.BlockSpec((h_p, d_out_p), lambda i: (0, 0)),
                pl.BlockSpec((1, d_out_p), lambda i: (0, 0)),
            ],
            out_specs=pl.BlockSpec((tb, d_out_p), lambda i: (i, 0)),
            compiler_params=compiler_params,
            cost_estimate=cost,
        )(xc, w1c, b1c, w2c, b2c)
    else:
        # Hidden dim streamed in th-chunks (weights too big for VMEM, e.g.
        # model-scale H on v7x's 64 MiB); fc2 partials accumulate in f32.
        out_p = pl.pallas_call(
            _mlp_kernel_hsplit,
            out_shape=out_shape,
            grid=(nb, nh),
            in_specs=[
                pl.BlockSpec((tb, d_in_p), lambda i, k: (i, 0)),
                pl.BlockSpec((d_in_p, th), lambda i, k: (0, k)),
                pl.BlockSpec((1, th), lambda i, k: (0, k)),
                pl.BlockSpec((th, d_out_p), lambda i, k: (k, 0)),
                pl.BlockSpec((1, d_out_p), lambda i, k: (0, 0)),
            ],
            out_specs=pl.BlockSpec((tb, d_out_p), lambda i, k: (i, 0)),
            scratch_shapes=[pltpu.VMEM((tb, d_out_p), jnp.float32)],
            compiler_params=compiler_params,
            cost_estimate=cost,
        )(xc, w1c, b1c, w2c, b2c)

    out = out_p if (b_p == B and d_out_p == D_out) else out_p[:B, :D_out]
    if len(orig_shape) != 2:
        out = out.reshape(orig_shape[:-1] + (D_out,))
    return out
    # TODO(synk): optional fp8 weight path (per-channel scales fused into the
    # bias/ReLU epilogue) for v7x compute-bound shapes.


# --------------------------------------------------------------------------- #
# Params / reference
# --------------------------------------------------------------------------- #
def init_mlp_params(key, input_dim, hidden_dim, output_dim, dtype=jnp.float32):
    """Mimics nn.Linear's uniform(-1/sqrt(fan_in), 1/sqrt(fan_in)) init.
    Weights stored pre-transposed, (in, out)."""
    k1, k2, k3, k4 = jax.random.split(key, 4)
    bound1 = 1.0 / (input_dim ** 0.5)
    bound2 = 1.0 / (hidden_dim ** 0.5)
    w1 = jax.random.uniform(k1, (input_dim, hidden_dim), dtype, -bound1, bound1)
    b1 = jax.random.uniform(k2, (1, hidden_dim), dtype, -bound1, bound1)
    w2 = jax.random.uniform(k3, (hidden_dim, output_dim), dtype, -bound2, bound2)
    b2 = jax.random.uniform(k4, (1, output_dim), dtype, -bound2, bound2)
    return w1, b1, w2, b2


def mlp_reference(x, w1, b1, w2, b2, compute_dtype=jnp.float32):
    h = jnp.dot(x.astype(compute_dtype), w1.astype(compute_dtype),
                preferred_element_type=jnp.float32)
    h = jnp.maximum(h + b1.astype(jnp.float32), 0.0)
    out = jnp.dot(h.astype(compute_dtype), w2.astype(compute_dtype),
                  preferred_element_type=jnp.float32)
    return out + b2.astype(jnp.float32)


# --------------------------------------------------------------------------- #
# Test
# --------------------------------------------------------------------------- #
if __name__ == "__main__":
    key = jax.random.PRNGKey(0)
    kx1, kp1, kx2, kp2 = jax.random.split(key, 4)

    # 1) Small shapes -> resident (single-pass) kernel, auto-picked tiles.
    B1, D1, H1, O1 = 8, 32, 64, 16
    x1 = jax.random.normal(kx1, (B1, D1), jnp.float32)
    p1 = init_mlp_params(kp1, D1, H1, O1)
    out1 = jax.block_until_ready(mlp_forward(x1, *p1))
    assert out1.shape == (B1, O1) and out1.dtype == jnp.float32
    ref1_bf = mlp_reference(x1, *p1, compute_dtype=jnp.bfloat16)
    ref1_f32 = mlp_reference(x1, *p1, compute_dtype=jnp.float32)
    assert jnp.allclose(out1, ref1_bf, atol=1e-4, rtol=1e-4)
    assert jnp.allclose(out1, ref1_f32, atol=5e-2, rtol=5e-2)

    # 2) Force the H-split (accumulator) path used when weights exceed VMEM,
    #    plus a multi-step batch axis (grid = (2, 2)).
    B2, D2, H2, O2 = 24, 128, 256, 128
    x2 = jax.random.normal(kx2, (B2, D2), jnp.float32)
    p2 = init_mlp_params(kp2, D2, H2, O2)
    out2 = jax.block_until_ready(mlp_forward(x2, *p2, block_b=16, block_h=128))
    assert out2.shape == (B2, O2) and out2.dtype == jnp.float32
    ref2_bf = mlp_reference(x2, *p2, compute_dtype=jnp.bfloat16)
    ref2_f32 = mlp_reference(x2, *p2, compute_dtype=jnp.float32)
    assert jnp.allclose(out2, ref2_bf, atol=2e-4, rtol=2e-4)
    assert jnp.allclose(out2, ref2_f32, atol=5e-2, rtol=5e-2)

    print("KERNEL_OK")
</pallas_src>

<mosaic_0001>
module attributes {stable_mosaic.version = 11 : i64} {
  func.func @_mlp_kernel_resident(%arg0: i32, %arg1: memref<16x128xf32, #tpu.memory_space<vmem>>, %arg2: memref<128x128xbf16, #tpu.memory_space<vmem>>, %arg3: memref<1x128xf32, #tpu.memory_space<vmem>>, %arg4: memref<128x128xbf16, #tpu.memory_space<vmem>>, %arg5: memref<1x128xf32, #tpu.memory_space<vmem>>, %arg6: memref<16x128xf32, #tpu.memory_space<vmem>>) attributes {dimension_semantics = [#tpu.dimension_semantics<parallel>], iteration_bounds = array<i64: 1>, scalar_prefetch = 0 : i64, scratch_operands = 0 : i64, tpu.core_type = #tpu.core_type<tc>, window_params = [{transform_indices = @transform_0, window_bounds = array<i64: 16, 128>}, {pipeline_mode = #tpu.pipeline_mode<synchronous>, transform_indices = @transform_1, window_bounds = array<i64: 128, 128>}, {pipeline_mode = #tpu.pipeline_mode<synchronous>, transform_indices = @transform_2, window_bounds = array<i64: 1, 128>}, {pipeline_mode = #tpu.pipeline_mode<synchronous>, transform_indices = @transform_3, window_bounds = array<i64: 128, 128>}, {pipeline_mode = #tpu.pipeline_mode<synchronous>, transform_indices = @transform_4, window_bounds = array<i64: 1, 128>}, {transform_indices = @transform_5, window_bounds = array<i64: 16, 128>}]} {
    %c0 = arith.constant 0 : index
    %c0_0 = arith.constant 0 : index
    %0 = vector.load %arg1[%c0, %c0_0] : memref<16x128xf32, #tpu.memory_space<vmem>>, vector<16x128xf32>
    %1 = arith.truncf %0 : vector<16x128xf32> to vector<16x128xbf16>
    %c0_1 = arith.constant 0 : index
    %c0_2 = arith.constant 0 : index
    %2 = vector.load %arg2[%c0_1, %c0_2] : memref<128x128xbf16, #tpu.memory_space<vmem>>, vector<128x128xbf16>
    %cst = arith.constant dense<0.000000e+00> : vector<16x128xf32>
    %3 = tpu.matmul %1, %2, %cst {dimension_numbers = #tpu.dot_dimension_numbers<[1], [0], [0], [1], [0, 0, 1, 1], [], []>} : vector<16x128xbf16>, vector<128x128xbf16>, vector<16x128xf32> -> vector<16x128xf32>
    %c0_3 = arith.constant 0 : index
    %c0_4 = arith.constant 0 : index
    %4 = vector.load %arg3[%c0_3, %c0_4] : memref<1x128xf32, #tpu.memory_space<vmem>>, vector<1x128xf32>
    %5 = vector.broadcast %4 : vector<1x128xf32> to vector<16x128xf32>
    %6 = arith.addf %3, %5 : vector<16x128xf32>
    %cst_5 = arith.constant 0.000000e+00 : f32
    %7 = vector.broadcast %cst_5 : f32 to vector<16x128xf32>
    %8 = arith.maximumf %6, %7 : vector<16x128xf32>
    %9 = arith.truncf %8 : vector<16x128xf32> to vector<16x128xbf16>
    %c0_6 = arith.constant 0 : index
    %c0_7 = arith.constant 0 : index
    %10 = vector.load %arg4[%c0_6, %c0_7] : memref<128x128xbf16, #tpu.memory_space<vmem>>, vector<128x128xbf16>
    %cst_8 = arith.constant dense<0.000000e+00> : vector<16x128xf32>
    %11 = tpu.matmul %9, %10, %cst_8 {dimension_numbers = #tpu.dot_dimension_numbers<[1], [0], [0], [1], [0, 0, 1, 1], [], []>} : vector<16x128xbf16>, vector<128x128xbf16>, vector<16x128xf32> -> vector<16x128xf32>
    %c0_9 = arith.constant 0 : index
    %c0_10 = arith.constant 0 : index
    %12 = vector.load %arg5[%c0_9, %c0_10] : memref<1x128xf32, #tpu.memory_space<vmem>>, vector<1x128xf32>
    %13 = vector.broadcast %12 : vector<1x128xf32> to vector<16x128xf32>
    %14 = arith.addf %11, %13 : vector<16x128xf32>
    %c0_11 = arith.constant 0 : index
    %c0_12 = arith.constant 0 : index
    %15 = vector.load %arg6[%c0_11, %c0_12] : memref<16x128xf32, #tpu.memory_space<vmem>>, vector<16x128xf32>
    tpu.vector_store %arg6[%c0_11, %c0_12], %14 {strides = array<i32>} : memref<16x128xf32, #tpu.memory_space<vmem>>, vector<16x128xf32>,
    return
  }
  func.func @transform_0(%arg0: i32) -> (i32, i32) {
    %c0_i32 = arith.constant 0 : i32
    %c0_i32_0 = arith.constant 0 : i32
    return %arg0, %c0_i32 : i32, i32
  }
  func.func @transform_1(%arg0: i32) -> (i32, i32) {
    %c0_i32 = arith.constant 0 : i32
    %c0_i32_0 = arith.constant 0 : i32
    %c0_i32_1 = arith.constant 0 : i32
    return %c0_i32, %c0_i32_0 : i32, i32
  }
  func.func @transform_2(%arg0: i32) -> (i32, i32) {
    %c0_i32 = arith.constant 0 : i32
    %c0_i32_0 = arith.constant 0 : i32
    %c0_i32_1 = arith.constant 0 : i32
    return %c0_i32, %c0_i32_0 : i32, i32
  }
  func.func @transform_3(%arg0: i32) -> (i32, i32) {
    %c0_i32 = arith.constant 0 : i32
    %c0_i32_0 = arith.constant 0 : i32
    %c0_i32_1 = arith.constant 0 : i32
    return %c0_i32, %c0_i32_0 : i32, i32
  }
  func.func @transform_4(%arg0: i32) -> (i32, i32) {
    %c0_i32 = arith.constant 0 : i32
    %c0_i32_0 = arith.constant 0 : i32
    %c0_i32_1 = arith.constant 0 : i32
    return %c0_i32, %c0_i32_0 : i32, i32
  }
  func.func @transform_5(%arg0: i32) -> (i32, i32) {
    %c0_i32 = arith.constant 0 : i32
    %c0_i32_0 = arith.constant 0 : i32
    return %arg0, %c0_i32 : i32, i32
  }
}

</mosaic_0001>

<bundles_post_ra>
// kernel: tpu_custom_call.1
= control target key start
LH: loop header
LB: loop body
LE: loop exit
PB: predicated region body
PF: predicated region fallthrough
CT: control target
= control target key end

     0   :  { %10 = vsyncpa [#allocation3], 0  ;;  %s615_s0 = inlined_call_operand.hbm [shape: f32[16,128], index: 0, kind: input, shape index: {}]   ;;  %s616_s1 = inlined_call_operand.hbm [shape: bf16[128,128], index: 1, kind: input, shape index: {}]   ;;  %s617_s2 = inlined_call_operand.vmem [shape: f32[1,128], index: 2, kind: input, shape index: {}]   ;;  %s618_s3 = inlined_call_operand.hbm [shape: bf16[128,128], index: 3, kind: input, shape index: {}]   ;;  %s619_s4 = inlined_call_operand.vmem [shape: f32[1,128], index: 4, kind: input, shape index: {}]   ;;  %s620_s5 = inlined_call_operand.hbm [shape: f32[16,128], index: 5, kind: output, shape index: {}]  }
   0x1   :  { %11 = vsyncpa [#allocation6], 0 }
   0x2   :  { %12 = vsyncpa [#allocation4], 0  ;;  %s509_s18 = smov [#allocation5]   ;;  %s415_s22 = scalar_lea.hbm %s616_s1, 1024 }
   0x3   :  { %s30_s19 = sshll.u32 %s509_s18, 4  ;;  %p416_p0 = scmp.ne.s32.totalorder %s616_s1, %s415_s22  ;;  %s31_s19 = int_to_ptr.vmem [resolvable:$true] %s30_s19 }
   0x4   :  { %p419_p1 = scmp.lt.u32.totalorder %s415_s22, %s616_s1 }
   0x6   :  { %p421_p2 = pnand %p419_p1, %p416_p0 }
   0x8   :  { %424 = shalt.err (!%p421_p2)
}
   0x9   :  { %s425_s27 = scalar_lea.vmem %s31_s19, 1024  ;;  %p430_p4 = scmp.lt.s32.totalorder %s31_s19, %s31_s19 }
   0xa   :  { %p426_p3 = scmp.ne.s32.totalorder %s31_s19, %s425_s27  ;;  %p431_p5 = scmp.lt.s32.totalorder %s425_s27, %s425_s27 }
   0xc   :  { %p432_p6 = por %p431_p5, %p430_p4 }
   0xe   :  { %p433_p7 = pnand %p432_p6, %p426_p3 }
  0x10   :  { %436 = shalt.err (!%p433_p7)
}
  0x11   :  { %s510_s28 = smov 64   ;;  %s511_s29 = smov 4  }
  0x12   :  { %36 = dma.hbm_to_vmem [thread:$0]  %s616_s1, 1024, %s31_s19, [#allocation6], %s510_s28, %s510_s28, %s511_s29  }
  0x13   :  { %s512_s7 = smov [#allocation2]   ;;  %s437_s11 = scalar_lea.hbm %s615_s0, 256 }
  0x14   :  { %s18_s8 = sshll.u32 %s512_s7, 4  ;;  %p438_p8 = scmp.ne.s32.totalorder %s615_s0, %s437_s11  ;;  %s19_s8 = int_to_ptr.vmem [resolvable:$true] %s18_s8 }
  0x15   :  { %p441_p9 = scmp.lt.u32.totalorder %s437_s11, %s615_s0 }
  0x17   :  { %p443_p10 = pnand %p441_p9, %p438_p8 }
  0x19   :  { %446 = shalt.err (!%p443_p10)
}
  0x1a   :  { %s447_s16 = scalar_lea.vmem %s19_s8, 256  ;;  %p452_p12 = scmp.lt.s32.totalorder %s19_s8, %s19_s8 }
  0x1b   :  { %p448_p11 = scmp.ne.s32.totalorder %s19_s8, %s447_s16  ;;  %p453_p13 = scmp.lt.s32.totalorder %s447_s16, %s447_s16 }
  0x1d   :  { %p454_p0 = por %p453_p13, %p452_p12 }
  0x1f   :  { %p455_p1 = pnand %p454_p0, %p448_p11 }
  0x21   :  { %458 = shalt.err (!%p455_p1)
}
  0x22   :  { %s513_s1 = smov 128   ;;  %s514_s17 = smov 8  }
  0x23   :  { %24 = dma.hbm_to_vmem [thread:$0]  %s615_s0, 256, %s19_s8, [#allocation3], %s513_s1, %s513_s1, %s514_s17  }
  0x24   :  { %s515_s20 = smov [#allocation7]   ;;  %s459_s24 = scalar_lea.hbm %s618_s3, 1024 }
  0x25   :  { %s44_s21 = sshll.u32 %s515_s20, 4  ;;  %p460_p2 = scmp.ne.s32.totalorder %s618_s3, %s459_s24  ;;  %s45_s21 = int_to_ptr.vmem [resolvable:$true] %s44_s21 }
  0x26   :  { %p463_p3 = scmp.lt.u32.totalorder %s459_s24, %s618_s3 }
  0x28   :  { %p465_p4 = pnand %p463_p3, %p460_p2 }
  0x2a   :  { %468 = shalt.err (!%p465_p4)
}
  0x2b   :  { %s469_s6 = scalar_lea.vmem %s45_s21, 1024  ;;  %p474_p6 = scmp.lt.s32.totalorder %s45_s21, %s45_s21 }
  0x2c   :  { %p470_p5 = scmp.ne.s32.totalorder %s45_s21, %s469_s6  ;;  %p475_p7 = scmp.lt.s32.totalorder %s469_s6, %s469_s6 }
  0x2e   :  { %p476_p8 = por %p475_p7, %p474_p6 }
  0x30   :  { %p477_p9 = pnand %p476_p8, %p470_p5 }
  0x32   :  { %480 = shalt.err (!%p477_p9)
}
  0x33   :  { %50 = dma.hbm_to_vmem [thread:$0]  %s618_s3, 1024, %s45_s21, [#allocation6], %s510_s28, %s510_s28, %s511_s29  }
  0x34   :  { %503 = dma.done.wait [#allocation3], 256  }
  0x35   :  { %504 = vsyncadd [#allocation3], 4294967040 }
  0x36   :  { %505 = dma.done.wait [#allocation6], 2048  }
  0x37   :  { %506 = vsyncadd [#allocation6], 4294965248  ;;  %v516_v0 = vmov 0.0   ;;  %vm517_vm0 = vmmov 0   ;;  %v399_v1 = vld [vmem:[#allocation5] sm:$0xff]   ;;  %v400_v2 = vld [vmem:[#allocation5 + $0x8] sm:$0xff]  }
  0x38   :  { %349 = vmatprep.subr.bf16.mxu0 %v516_v0  ;;  %365 = vmatprep.mubr.msk.bf16.mxu0 %vm517_vm0, %v516_v0  ;;  %v401_v3 = vld [vmem:[#allocation5 + $0x10] sm:$0xff]   ;;  %v407_v4 = vld [vmem:[#allocation7] sm:$0xff]   ;;  %v402_v5 = vld [vmem:[#allocation5 + $0x18] sm:$0xff]   ;;  %s518_s9 = smov [#allocation8]  }
  0x39   :  { %369 = vmatprep.subr.bf16.mxu1 %v516_v0  ;;  %385 = vmatprep.mubr.msk.bf16.mxu1 %vm517_vm0, %v516_v0  ;;  %v408_v6 = vld [vmem:[#allocation7 + $0x8] sm:$0xff]   ;;  %v403_v7 = vld [vmem:[#allocation5 + $0x20] sm:$0xff]   ;;  %v409_v8 = vld [vmem:[#allocation7 + $0x10] sm:$0xff]   ;;  %s300_s10 = sshll.u32 %s518_s9, 4  ;;  %s301_s10 = int_to_ptr.vmem [resolvable:$true] %s300_s10 }
  0x3a   :  { %350 = vmatpush3.bf16.msra.mxu0 %v399_v1  ;;  %370 = vmatpush3.bf16.msra.mxu1 %v407_v4  ;;  %v404_v9 = vld [vmem:[#allocation5 + $0x28] sm:$0xff]   ;;  %v410_v10 = vld [vmem:[#allocation7 + $0x18] sm:$0xff]   ;;  %v405_v11 = vld [vmem:[#allocation5 + $0x30] sm:$0xff]   ;;  %p486_p11 = scmp.lt.s32.totalorder %s301_s10, %s301_s10 }
  0x3b   :  { %351 = vmatprep.subr.bf16.mxu0 %v516_v0  ;;  %371 = vmatprep.subr.bf16.mxu1 %v516_v0  ;;  %v411_v12 = vld [vmem:[#allocation7 + $0x20] sm:$0xff]   ;;  %v406_v13 = vld [vmem:[#allocation5 + $0x38] sm:$0xff]   ;;  %v63_v14 = vld [vmem:[#allocation2] sm:$0xff] }
  0x3c   :  { %v64_v15 = vld [vmem:[#allocation2 + $0x8] sm:$0xff]  ;;  %v412_v16 = vld [vmem:[#allocation7 + $0x28] sm:$0xff]   ;;  %v413_v18 = vld [vmem:[#allocation7 + $0x30] sm:$0xff]  }
  0x3d   :  { %v65_v17 = vpack.c.bf16 %v64_v15, %v63_v14  ;;  %v414_v19 = vld [vmem:[#allocation7 + $0x38] sm:$0xff]   ;;  %v313_v20 = vld [vmem:[%s617_s2] ss:$0 sm:$0xff]  ;;  %s481_s2 = scalar_lea.vmem %s301_s10, 256 }
  0x3e   :  { %352 = vmatpush3.bf16.msra.mxu0 %v400_v2  ;;  %372 = vmatpush3.bf16.msra.mxu1 %v408_v6  ;;  %v322_v30 = vld [vmem:[%s619_s4] ss:$0 sm:$0xff]  ;;  %p482_p10 = scmp.ne.s32.totalorder %s301_s10, %s481_s2  ;;  %p487_p12 = scmp.lt.s32.totalorder %s481_s2, %s481_s2 }
  0x3f   :  { %353 = vmatprep.subr.bf16.mxu0 %v516_v0  ;;  %373 = vmatprep.subr.bf16.mxu1 %v516_v0 }
  0x40   :  { %p488_p13 = por %p487_p12, %p486_p11 }
  0x42   :  { %354 = vmatpush3.bf16.msra.mxu0 %v401_v3  ;;  %374 = vmatpush3.bf16.msra.mxu1 %v409_v8  ;;  %p489_p0 = pnand %p488_p13, %p482_p10 }
  0x43   :  { %355 = vmatprep.subr.bf16.mxu0 %v516_v0  ;;  %375 = vmatprep.subr.bf16.mxu1 %v516_v0 }
  0x46   :  { %356 = vmatpush3.bf16.msra.mxu0 %v402_v5  ;;  %376 = vmatpush3.bf16.msra.mxu1 %v410_v10 }
  0x47   :  { %357 = vmatprep.subr.bf16.mxu0 %v516_v0  ;;  %377 = vmatprep.subr.bf16.mxu1 %v516_v0 }
  0x4a   :  { %358 = vmatpush3.bf16.msra.mxu0 %v403_v7  ;;  %378 = vmatpush3.bf16.msra.mxu1 %v411_v12 }
  0x4b   :  { %359 = vmatprep.subr.bf16.mxu0 %v516_v0  ;;  %379 = vmatprep.subr.bf16.mxu1 %v516_v0 }
  0x4e   :  { %360 = vmatpush3.bf16.msra.mxu0 %v404_v9  ;;  %380 = vmatpush3.bf16.msra.mxu1 %v412_v16 }
  0x4f   :  { %361 = vmatprep.subr.bf16.mxu0 %v516_v0  ;;  %381 = vmatprep.subr.bf16.mxu1 %v516_v0 }
  0x52   :  { %362 = vmatpush3.bf16.msra.mxu0 %v405_v11  ;;  %382 = vmatpush3.bf16.msra.mxu1 %v413_v18 }
  0x53   :  { %363 = vmatprep.subr.bf16.mxu0 %v516_v0  ;;  %383 = vmatprep.subr.bf16.mxu1 %v516_v0 }
  0x56   :  { %364 = vmatpush3.bf16.msra.mxu0 %v406_v13  ;;  %384 = vmatpush3.bf16.msra.mxu1 %v414_v19 }
  0x59   :  { %366 = vmatmul.mubr.bf16.vlgmr.msra.gmra.mrb[0].mxu0 %v65_v17 }
 0x12c   :  { %v171_v21 = vpop.f32.mrb[0].mxu0 }
 0x12d   :  { %v172_v22 = vadd.f32 %v313_v20, %v171_v21  ;;  %v367_v23 = vpop.f32.mrb[1].mxu0 }
 0x12e   :  { %v174_v24 = vpop.f32.mrb[2].mxu0 }
 0x12f   :  { %v175_v25 = vadd.f32 %v313_v20, %v174_v24  ;;  %v368_v26 = vpop.f32.mrb[3].mxu0  ;;  %v178_v27 = vmax.f32 %v172_v22, 0.0 }
 0x131   :  { %v179_v28 = vmax.f32 %v175_v25, 0.0 }
 0x133   :  { %v180_v29 = vpack.c.bf16 %v179_v28, %v178_v27 }
 0x135   :  { %386 = vmatmul.mubr.bf16.vlgmr.msra.gmra.mrb[0].mxu1 %v180_v29 }
 0x208   :  { %v286_v31 = vpop.f32.mrb[0].mxu1 }
 0x209   :  { %v287_v32 = vadd.f32 %v322_v30, %v286_v31  ;;  %v387_v33 = vpop.f32.mrb[1].mxu1 }
 0x20a   :  { %v289_v34 = vpop.f32.mrb[2].mxu1 }
 0x20b   :  { %293 = vst [vmem:[#allocation8] sm:$0xff] %v287_v32  ;;  %v290_v35 = vadd.f32 %v322_v30, %v289_v34  ;;  %v388_v36 = vpop.f32.mrb[3].mxu1 }
 0x20d   :  { %294 = vst [vmem:[#allocation8 + $0x8] sm:$0xff] %v290_v35 }
 0x20e   :  { %492 = shalt.err (!%p489_p0)
}
 0x20f   :  { %s493_s12 = scalar_lea.hbm %s620_s5, 256 }
 0x210   :  { %p494_p1 = scmp.ne.s32.totalorder %s620_s5, %s493_s12  ;;  %p497_p2 = scmp.lt.u32.totalorder %s493_s12, %s620_s5 }
 0x212   :  { %p499_p3 = pnand %p497_p2, %p494_p1 }
 0x214   :  { %502 = shalt.err (!%p499_p3)
}
 0x215   :  { %306 = dma.vmem_to_hbm [thread:$0]  %s301_s10, 256, %s620_s5, [#allocation4], %s513_s1, %s513_s1, %s514_s17  }
 0x216   :  { %507 = dma.done.wait [#allocation4], 256  }
 0x217   :  { %508 = vsyncadd [#allocation4], 4294967040 }
 0x218   :  { %310 = vsyncpa [#allocation3], 1 }
 0x219   :  { %311 = vsyncpa [#allocation6], 1 }
 0x21a   :  { %312 = vsyncpa [#allocation4], 1 }

</bundles_post_ra>
